<compile_context>
chip_gen: v5e
topology: v5e:2x2
jax: 0.10.0
libtpu: 0.0.40
codegen_flags: <defaults>
</compile_context>

<pallas_src>
import jax
import jax.numpy as jnp
from jax.experimental import pallas as pl
from jax.experimental.pallas import tpu as pltpu  # noqa: F401


# ----------------------------------------------------------------------------
# Fused Pallas kernel: Linear -> ReLU -> Linear -> Sigmoid
# ----------------------------------------------------------------------------
def _autoencoder_kernel(x_ref, w1_ref, b1_ref, w2_ref, b2_ref, enc_ref, dec_ref):
    # x: (M, K), w1: (K, H), b1: (1, H), w2: (H, N), b2: (1, N)
    x = x_ref[...]

    # encoder: relu(x @ W1 + b1)
    h = jnp.dot(x, w1_ref[...], preferred_element_type=jnp.float32)
    h = h + b1_ref[...]
    h = jnp.maximum(h, 0.0)
    enc_ref[...] = h.astype(enc_ref.dtype)

    # decoder: sigmoid(h @ W2 + b2)
    d = jnp.dot(h.astype(w2_ref.dtype), w2_ref[...],
                preferred_element_type=jnp.float32)
    d = d + b2_ref[...]
    dec_ref[...] = (1.0 / (1.0 + jnp.exp(-d))).astype(dec_ref.dtype)


def autoencoder_forward(params, x):
    """Returns (encoded, decoded) from a single fused Pallas kernel call."""
    w1, b1 = params["w1"], params["b1"]
    w2, b2 = params["w2"], params["b2"]
    M, K = x.shape
    Kw, H = w1.shape
    Hw, N = w2.shape
    assert K == Kw and H == Hw, (x.shape, w1.shape, w2.shape)

    return pl.pallas_call(
        _autoencoder_kernel,
        out_shape=(
            jax.ShapeDtypeStruct((M, H), x.dtype),
            jax.ShapeDtypeStruct((M, N), x.dtype),
        ),
        in_specs=[
            pl.BlockSpec((M, K), lambda: (0, 0)),   # x
            pl.BlockSpec((K, H), lambda: (0, 0)),   # W1 (in, out)
            pl.BlockSpec((1, H), lambda: (0, 0)),   # b1
            pl.BlockSpec((H, N), lambda: (0, 0)),   # W2 (in, out)
            pl.BlockSpec((1, N), lambda: (0, 0)),   # b2
        ],
        out_specs=(
            pl.BlockSpec((M, H), lambda: (0, 0)),   # encoded
            pl.BlockSpec((M, N), lambda: (0, 0)),   # decoded
        ),
    )(x, w1, b1.reshape(1, H), w2, b2.reshape(1, N))


# ----------------------------------------------------------------------------
# Parameter construction (deterministic, mimics nn.Linear default init)
# ----------------------------------------------------------------------------
def _init_linear(key, in_features, out_features, dtype=jnp.float32):
    kw, kb = jax.random.split(key)
    bound = 1.0 / jnp.sqrt(jnp.float32(in_features))
    # stored transposed relative to PyTorch: (in, out)
    w = jax.random.uniform(kw, (in_features, out_features), dtype, -bound, bound)
    b = jax.random.uniform(kb, (out_features,), dtype, -bound, bound)
    return w, b


def make_params(key, input_size, embedding_dimension=None, hidden=32,
                dtype=jnp.float32):
    # `embedding_dimension` is accepted for API parity with the PyTorch module
    # but, like the reference, is not used for layer shapes (hidden is 32).
    del embedding_dimension
    k1, k2 = jax.random.split(key)
    w1, b1 = _init_linear(k1, input_size, hidden, dtype)   # layer1
    w2, b2 = _init_linear(k2, hidden, input_size, dtype)   # layer2
    return {"w1": w1, "b1": b1, "w2": w2, "b2": b2}


# ----------------------------------------------------------------------------
if __name__ == "__main__":
    batch = 8
    input_size = 64
    embedding_dimension = 32   # unused by the reference module's layer shapes
    hidden = 32

    key = jax.random.PRNGKey(0)
    k_params, k_x = jax.random.split(key)

    params = make_params(k_params, input_size, embedding_dimension, hidden)
    x = jax.random.normal(k_x, (batch, input_size), dtype=jnp.float32)

    fwd = jax.jit(autoencoder_forward)
    encoded, decoded = fwd(params, x)
    jax.block_until_ready((encoded, decoded))

    # Reference check against plain JAX.
    ref_h = jnp.maximum(x @ params["w1"] + params["b1"], 0.0)
    ref_enc = ref_h
    ref_dec = jax.nn.sigmoid(ref_h @ params["w2"] + params["b2"])

    assert encoded.shape == (batch, hidden)
    assert decoded.shape == (batch, input_size)
    assert jnp.allclose(encoded, ref_enc, atol=1e-5, rtol=1e-5)
    assert jnp.allclose(decoded, ref_dec, atol=1e-5, rtol=1e-5)

    print("KERNEL_OK")
</pallas_src>

<mosaic_0001>
module attributes {stable_mosaic.version = 11 : i64} {
  func.func @_autoencoder_kernel(%arg0: memref<8x64xf32, #tpu.memory_space<vmem>>, %arg1: memref<64x32xf32, #tpu.memory_space<vmem>>, %arg2: memref<1x32xf32, #tpu.memory_space<vmem>>, %arg3: memref<32x64xf32, #tpu.memory_space<vmem>>, %arg4: memref<1x64xf32, #tpu.memory_space<vmem>>, %arg5: memref<8x32xf32, #tpu.memory_space<vmem>>, %arg6: memref<8x64xf32, #tpu.memory_space<vmem>>) attributes {dimension_semantics = [], scalar_prefetch = 0 : i64, scratch_operands = 0 : i64, tpu.core_type = #tpu.core_type<tc>} {
    %c0 = arith.constant 0 : index
    %c0_0 = arith.constant 0 : index
    %0 = vector.load %arg0[%c0, %c0_0] : memref<8x64xf32, #tpu.memory_space<vmem>>, vector<8x64xf32>
    %c0_1 = arith.constant 0 : index
    %c0_2 = arith.constant 0 : index
    %1 = vector.load %arg1[%c0_1, %c0_2] : memref<64x32xf32, #tpu.memory_space<vmem>>, vector<64x32xf32>
    %cst = arith.constant dense<0.000000e+00> : vector<8x32xf32>
    %2 = tpu.matmul %0, %1, %cst {dimension_numbers = #tpu.dot_dimension_numbers<[1], [0], [0], [1], [0, 0, 1, 1], [], []>} : vector<8x64xf32>, vector<64x32xf32>, vector<8x32xf32> -> vector<8x32xf32>
    %c0_3 = arith.constant 0 : index
    %c0_4 = arith.constant 0 : index
    %3 = vector.load %arg2[%c0_3, %c0_4] : memref<1x32xf32, #tpu.memory_space<vmem>>, vector<1x32xf32>
    %4 = vector.broadcast %3 : vector<1x32xf32> to vector<8x32xf32>
    %5 = arith.addf %2, %4 : vector<8x32xf32>
    %cst_5 = arith.constant 0.000000e+00 : f32
    %6 = vector.broadcast %cst_5 : f32 to vector<8x32xf32>
    %7 = arith.maximumf %5, %6 : vector<8x32xf32>
    %c0_6 = arith.constant 0 : index
    %c0_7 = arith.constant 0 : index
    %8 = vector.load %arg5[%c0_6, %c0_7] : memref<8x32xf32, #tpu.memory_space<vmem>>, vector<8x32xf32>
    tpu.vector_store %arg5[%c0_6, %c0_7], %7 {strides = array<i32>} : memref<8x32xf32, #tpu.memory_space<vmem>>, vector<8x32xf32>,
    %c0_8 = arith.constant 0 : index
    %c0_9 = arith.constant 0 : index
    %9 = vector.load %arg3[%c0_8, %c0_9] : memref<32x64xf32, #tpu.memory_space<vmem>>, vector<32x64xf32>
    %cst_10 = arith.constant dense<0.000000e+00> : vector<8x64xf32>
    %10 = tpu.matmul %7, %9, %cst_10 {dimension_numbers = #tpu.dot_dimension_numbers<[1], [0], [0], [1], [0, 0, 1, 1], [], []>} : vector<8x32xf32>, vector<32x64xf32>, vector<8x64xf32> -> vector<8x64xf32>
    %c0_11 = arith.constant 0 : index
    %c0_12 = arith.constant 0 : index
    %11 = vector.load %arg4[%c0_11, %c0_12] : memref<1x64xf32, #tpu.memory_space<vmem>>, vector<1x64xf32>
    %12 = vector.broadcast %11 : vector<1x64xf32> to vector<8x64xf32>
    %13 = arith.addf %10, %12 : vector<8x64xf32>
    %cst_13 = arith.constant 0.000000e+00 : f32
    %14 = vector.broadcast %cst_13 : f32 to vector<8x64xf32>
    %15 = arith.subf %14, %13 : vector<8x64xf32>
    %16 = math.exp %15 : vector<8x64xf32>
    %cst_14 = arith.constant 1.000000e+00 : f32
    %17 = vector.broadcast %cst_14 : f32 to vector<8x64xf32>
    %18 = arith.addf %17, %16 : vector<8x64xf32>
    %cst_15 = arith.constant 1.000000e+00 : f32
    %19 = vector.broadcast %cst_15 : f32 to vector<8x64xf32>
    %20 = arith.divf %19, %18 : vector<8x64xf32>
    %c0_16 = arith.constant 0 : index
    %c0_17 = arith.constant 0 : index
    %21 = vector.load %arg6[%c0_16, %c0_17] : memref<8x64xf32, #tpu.memory_space<vmem>>, vector<8x64xf32>
    tpu.vector_store %arg6[%c0_16, %c0_17], %20 {strides = array<i32>} : memref<8x64xf32, #tpu.memory_space<vmem>>, vector<8x64xf32>,
    return
  }
}

</mosaic_0001>

<bundles_post_ra>
// kernel: autoencoder_forward.1
= control target key start
LH: loop header
LB: loop body
LE: loop exit
PB: predicated region body
PF: predicated region fallthrough
CT: control target
= control target key end

     0   :  { %12 = vsyncpa [#allocation3], 0  ;;  %s299_s0 = inlined_call_operand.vmem [shape: f32[8,64], index: 0, kind: input, shape index: {}]   ;;  %s300_s1 = inlined_call_operand.vmem [shape: f32[64,32], index: 1, kind: input, shape index: {}]   ;;  %s301_s2 = inlined_call_operand.vmem [shape: f32[1,32], index: 2, kind: input, shape index: {}]   ;;  %s302_s3 = inlined_call_operand.vmem [shape: f32[32,64], index: 3, kind: input, shape index: {}]   ;;  %s303_s4 = inlined_call_operand.vmem [shape: f32[1,64], index: 4, kind: input, shape index: {}]   ;;  %s304_s5 = inlined_call_operand.hbm [shape: f32[8,32], index: 5, kind: output, shape index: {0}]   ;;  %s305_s6 = inlined_call_operand.hbm [shape: f32[8,64], index: 6, kind: output, shape index: {1}]  }
   0x1   :  { %v32_v0 = vld [vmem:[%s300_s1 + $0x38] sm:$0xff]  ;;  %v31_v1 = vld [vmem:[%s300_s1 + $0x30] sm:$0xff]  ;;  %v30_v2 = vld [vmem:[%s300_s1 + $0x28] sm:$0xff] }
   0x2   :  { %49 = vmatpush.msra.mxu0 %v32_v0  ;;  %v67_v3 = vld [vmem:[%s302_s3 + $0x18] sm:$0xff]  ;;  %v29_v4 = vld [vmem:[%s300_s1 + $0x20] sm:$0xff] }
   0x3   :  { %87 = vmatpush.msra.mxu1 %v67_v3 }
   0x4   :  { %50 = vmatpush.msra.mxu0 %v31_v1 }
   0x5   :  { %13 = vsyncpa [#allocation5], 0  ;;  %v28_v5 = vld [vmem:[%s300_s1 + $0x18] sm:$0xff]  ;;  %v27_v6 = vld [vmem:[%s300_s1 + $0x10] sm:$0xff]  ;;  %vm37_vm0 = vcmask 523264   ;;  %vm62_vm1 = vcmask 261120  }
   0x6   :  { %51 = vmatpush.msra.mxu0 %v30_v2  ;;  %v26_v7 = vld [vmem:[%s300_s1 + $0x8] sm:$0xff]  ;;  %v25_v8 = vld [vmem:[%s300_s1] sm:$0xff]  ;;  %v66_v10 = vld [vmem:[%s302_s3 + $0x10] sm:$0xff]  ;;  %s122_s25 = sshll.u32 %s304_s5, 4  ;;  %s209_s26 = smov [#allocation2]   ;;  %s123_s25 = int_to_ptr.hbm [resolvable:$true] %s122_s25 }
   0x7   :  { %v24_v9 = vld [vmem:[%s299_s0] sm:$0xff]  ;;  %88 = vmatpush.msra.mxu1 %v66_v10  ;;  %v65_v11 = vld [vmem:[%s302_s3 + $0x8] sm:$0xff]  ;;  %s120_s27 = sshll.u32 %s209_s26, 4  ;;  %s121_s27 = int_to_ptr.vmem [resolvable:$true] %s120_s27 }
   0x8   :  { %52 = vmatpush.msra.mxu0 %v29_v4  ;;  %v64_v12 = vld [vmem:[%s302_s3] sm:$0xff] }
   0x9   :  { %89 = vmatpush.msra.mxu1 %v65_v11  ;;  %v151_v13 = vld [vmem:[%s301_s2] ss:$0 sm:$0xff]  ;;  %s210_s2 = smov [#allocation4]  }
   0xa   :  { %53 = vmatpush.msra.mxu0 %v28_v5  ;;  %v152_v17 = vld [vmem:[%s303_s4] ss:$0 sm:$0xff]  ;;  %s131_s5 = sshll.u32 %s210_s2, 4  ;;  %s133_s4 = sshll.u32 %s305_s6, 4  ;;  %s132_s5 = int_to_ptr.vmem [resolvable:$true] %s131_s5  ;;  %s134_s4 = int_to_ptr.hbm [resolvable:$true] %s133_s4 }
   0xb   :  { %90 = vmatpush.msra.mxu1 %v64_v12 }
   0xc   :  { %54 = vmatpush.msra.mxu0 %v27_v6 }
   0xe   :  { %55 = vmatpush.msra.mxu0 %v26_v7 }
  0x10   :  { %56 = vmatpush.msra.mxu0 %v25_v8 }
  0x11   :  { %147 = vmatmul.msk.f32.vlgmr.msra.gmra.mxu0 %vm37_vm0, %v24_v9 }
  0x8e   :  { %v58_v14 = vpop.f32.mrf.mxu0 }
  0x8f   :  { %v59_v15 = vadd.f32 %v151_v13, %v58_v14 }
  0x91   :  { %v61_v16 = vmax.f32 %v59_v15, 0.0 }
  0x93   :  { %148 = vmatmul.msk.f32.vlgmr.msra.gmra.mxu1 %vm62_vm1, %v61_v16  ;;  %63 = vst.msk [vmem:[#allocation2] sm:$0xff] %vm62_vm1, %v61_v16 }
  0x94   :  { %125 = dma.vmem_to_hbm [thread:$0]  %s121_s27, 128, %s123_s25, [#allocation3]  }
 0x110   :  { %v92_v18 = vpop.f32.mrf.mxu1 }
 0x111   :  { %v93_v19 = vadd.f32 %v152_v17, %v92_v18 }
 0x113   :  { %v95_v20 = vsub.f32 0.0, %v93_v19 }
 0x115   :  { %v96_v21 = vmul.f32 1.442695, %v95_v20 }
 0x117   :  { %153 = vpow2.f32 %v96_v21 }
 0x11d   :  { %v154_v22 = vpop.eup %153 }
 0x11e   :  { %v98_v23 = vadd.f32 1.0, %v154_v22 }
 0x120   :  { %155 = vrcp.f32 %v98_v23  ;;  %v110_v27 = vand.u32 2147483648, %v98_v23  ;;  %v108_v29 = vand.u32 2147483647, %v98_v23  ;;  %vm104_vm3 = vweird.f32 %v98_v23 }
 0x122   :  { %v111_v31 = vor.u32 1.1754944e-38, %v110_v27  ;;  %vm109_vm5 = vcmp.eq.f32.partialorder %v108_v29, 8.507059e+37 }
 0x126   :  { %v156_v24 = vpop.eup %155 }
 0x127   :  { %v100_v25 = vmul.f32 %v156_v24, %v98_v23  ;;  %vm105_vm2 = vweird.f32 %v156_v24 }
 0x128   :  { %vm106_vm4 = vmor %vm104_vm3, %vm105_vm2 }
 0x129   :  { %v101_v26 = vsub.f32 1.0, %v100_v25 }
 0x12b   :  { %v102_v28 = vmul.f32 %v156_v24, %v101_v26 }
 0x12d   :  { %v103_v30 = vadd.f32 %v156_v24, %v102_v28 }
 0x12f   :  { %v107_v32 = vsel %vm106_vm4, %v156_v24, %v103_v30 }
 0x130   :  { %v112_v33 = vsel %vm109_vm5, %v111_v31, %v107_v32 }
 0x131   :  { %114 = vst.msk [vmem:[#allocation4] sm:$0xff] %vm37_vm0, %v112_v33 }
 0x132   :  { %136 = dma.vmem_to_hbm [thread:$0]  %s132_s5, 128, %s134_s4, [#allocation5]  }
 0x133   :  { %205 = dma.done.wait [#allocation3], 128  }
 0x134   :  { %206 = vsyncadd [#allocation3], 4294967168 }
 0x135   :  { %207 = dma.done.wait [#allocation5], 128  }
 0x136   :  { %208 = vsyncadd [#allocation5], 4294967168 }
 0x137   :  { %145 = vsyncpa [#allocation3], 1 }
 0x138   :  { %146 = vsyncpa [#allocation5], 1 }

</bundles_post_ra>
